<compile_context>
chip_gen: v6e
topology: v6e:2x2x1
jax: 0.10.0
libtpu: 0.0.40
codegen_flags: <defaults>
</compile_context>

<pallas_src>
import functools

import jax
import jax.numpy as jnp
from jax import lax
from jax.experimental import pallas as pl
from jax.experimental.pallas import tpu as pltpu


def _round_up(x, m):
    return ((x + m - 1) // m) * m


def _npcc_kernel(p_ref, t_ref, o_ref, sp, st, spt, spp, stt, *, n_true):
    """Streaming raw-moment reduction over the lane (N) grid axis."""
    k = pl.program_id(1)

    @pl.when(k == 0)
    def _():
        sp[...] = jnp.zeros_like(sp)
        st[...] = jnp.zeros_like(st)
        spt[...] = jnp.zeros_like(spt)
        spp[...] = jnp.zeros_like(spp)
        stt[...] = jnp.zeros_like(stt)

    p = p_ref[...].astype(jnp.float32)
    t = t_ref[...].astype(jnp.float32)

    sp[...] += jnp.sum(p, axis=-1, keepdims=True)
    st[...] += jnp.sum(t, axis=-1, keepdims=True)
    spt[...] += jnp.sum(p * t, axis=-1, keepdims=True)
    spp[...] += jnp.sum(p * p, axis=-1, keepdims=True)
    stt[...] += jnp.sum(t * t, axis=-1, keepdims=True)

    @pl.when(k == pl.num_programs(1) - 1)
    def _():
        inv_n = jnp.float32(1.0 / n_true)
        num = spt[...] - sp[...] * st[...] * inv_n
        svp = spp[...] - sp[...] * sp[...] * inv_n
        svt = stt[...] - st[...] * st[...] * inv_n
        # -num / (sqrt(svp) * sqrt(svt)) == -num * rsqrt(svp * svt)  (EUP path).
        # No epsilon in the denominator, matching PyTorch NpccLoss semantics.
        o_ref[...] = -num * lax.rsqrt(svp * svt)


@functools.partial(jax.jit, static_argnames=("reduction",))
def npcc_loss(pred, target, reduction=True):
    """Negative Pearson correlation loss, identical semantics to NpccLoss.forward."""
    B, C = pred.shape[0], pred.shape[1]
    p2 = pred.reshape(B * C, -1)
    t2 = target.reshape(B * C, -1)
    M, N = p2.shape

    itemsize = jnp.dtype(p2.dtype).itemsize
    # ~2 MiB per input block => 2 inputs x 2 pipeline buffers ~= 8 MiB in VMEM,
    # well under the default scoped-VMEM limit on v5e/v6e/v7x.
    max_block_elems = (2 * 1024 * 1024) // itemsize

    # Lane tile: keep it wide (dense, unmasked vector loads), multiple of 128.
    n128 = _round_up(N, 128)
    tn = min(n128, 4096)
    # Row tile: biggest multiple of 8 that keeps the block under budget.
    bm_cap = max(8, ((max_block_elems // tn) // 8) * 8)
    bm = min(_round_up(M, 8), bm_cap, 512)

    M_pad = _round_up(M, bm)
    N_pad = _round_up(N, tn)

    if (M_pad, N_pad) != (M, N):
        # Zero padding is exact: padded elements add 0 to every raw moment and
        # the TRUE N is used in the finalize. Padded rows are sliced off below.
        p2 = jnp.pad(p2, ((0, M_pad - M), (0, N_pad - N)))
        t2 = jnp.pad(t2, ((0, M_pad - M), (0, N_pad - N)))

    grid = (M_pad // bm, N_pad // tn)

    cost = pl.pallas_call(
        functools.partial(_npcc_kernel, n_true=N),
        out_shape=jax.ShapeDtypeStruct((M_pad, 1), jnp.float32),
        grid_spec=pltpu.PrefetchScalarGridSpec(
            num_scalar_prefetch=0,
            grid=grid,
            in_specs=[
                pl.BlockSpec((bm, tn), lambda i, k: (i, k)),
                pl.BlockSpec((bm, tn), lambda i, k: (i, k)),
            ],
            out_specs=pl.BlockSpec((bm, 1), lambda i, k: (i, 0)),
            scratch_shapes=[pltpu.VMEM((bm, 1), jnp.float32) for _ in range(5)],
        ),
        compiler_params=pltpu.CompilerParams(
            dimension_semantics=("parallel", "arbitrary"),
        ),
    )(p2, t2)

    cost = cost[:M, 0].reshape(B, C)
    if reduction:
        return jnp.mean(cost)
    return cost


def _npcc_ref(pred, target, reduction=True):
    """Pure-JAX reference mirroring the PyTorch module."""
    B, C = pred.shape[0], pred.shape[1]
    p = pred.reshape(B, C, -1)
    t = target.reshape(B, C, -1)
    vp = p - jnp.mean(p, axis=2, keepdims=True)
    vt = t - jnp.mean(t, axis=2, keepdims=True)
    cost = -jnp.sum(vp * vt, axis=2) / (
        jnp.sqrt(jnp.sum(vp**2, axis=2)) * jnp.sqrt(jnp.sum(vt**2, axis=2))
    )
    if reduction:
        return jnp.mean(cost)
    return cost


if __name__ == "__main__":
    key = jax.random.PRNGKey(0)
    kp, kt = jax.random.split(key)
    B, C, H, W = 2, 4, 16, 16
    pred = jax.random.normal(kp, (B, C, H, W), dtype=jnp.float32)
    target = jax.random.normal(kt, (B, C, H, W), dtype=jnp.float32)

    out_reduced = jax.block_until_ready(npcc_loss(pred, target, reduction=True))
    out_full = jax.block_until_ready(npcc_loss(pred, target, reduction=False))

    ref_reduced = _npcc_ref(pred, target, reduction=True)
    ref_full = _npcc_ref(pred, target, reduction=False)

    assert out_full.shape == (B, C)
    assert jnp.allclose(out_reduced, ref_reduced, atol=1e-4, rtol=1e-4)
    assert jnp.allclose(out_full, ref_full, atol=1e-4, rtol=1e-4)

    print("KERNEL_OK")
</pallas_src>

<mosaic_0001>
module attributes {stable_mosaic.version = 11 : i64} {
  func.func @_npcc_kernel(%arg0: i32, %arg1: i32, %arg2: memref<8x256xf32, #tpu.memory_space<vmem>>, %arg3: memref<8x256xf32, #tpu.memory_space<vmem>>, %arg4: memref<8x1xf32, #tpu.memory_space<vmem>>, %arg5: memref<8x1xf32, #tpu.memory_space<vmem>>, %arg6: memref<8x1xf32, #tpu.memory_space<vmem>>, %arg7: memref<8x1xf32, #tpu.memory_space<vmem>>, %arg8: memref<8x1xf32, #tpu.memory_space<vmem>>, %arg9: memref<8x1xf32, #tpu.memory_space<vmem>>) attributes {dimension_semantics = [#tpu.dimension_semantics<parallel>, #tpu.dimension_semantics<arbitrary>], iteration_bounds = array<i64: 1, 1>, scalar_prefetch = 0 : i64, scratch_operands = 5 : i64, tpu.core_type = #tpu.core_type<tc>, window_params = [{transform_indices = @transform_0, window_bounds = array<i64: 8, 256>}, {transform_indices = @transform_1, window_bounds = array<i64: 8, 256>}, {transform_indices = @transform_2, window_bounds = array<i64: 8, 1>}]} {
    %c0_i32 = arith.constant 0 : i32
    %0 = arith.cmpi eq, %arg1, %c0_i32 : i32
    %1 = arith.extui %0 : i1 to i32
    %c0_i32_0 = arith.constant 0 : i32
    %2 = arith.cmpi ne, %1, %c0_i32_0 : i32
    scf.if %2 {
      %cst_30 = arith.constant 0.000000e+00 : f32
      %36 = vector.broadcast %cst_30 : f32 to vector<8x1xf32>
      %c0_31 = arith.constant 0 : index
      %c0_32 = arith.constant 0 : index
      %37 = vector.load %arg5[%c0_31, %c0_32] : memref<8x1xf32, #tpu.memory_space<vmem>>, vector<8x1xf32>
      tpu.vector_store %arg5[%c0_31, %c0_32], %36 {strides = array<i32>} : memref<8x1xf32, #tpu.memory_space<vmem>>, vector<8x1xf32>,
      %cst_33 = arith.constant 0.000000e+00 : f32
      %38 = vector.broadcast %cst_33 : f32 to vector<8x1xf32>
      %c0_34 = arith.constant 0 : index
      %c0_35 = arith.constant 0 : index
      %39 = vector.load %arg6[%c0_34, %c0_35] : memref<8x1xf32, #tpu.memory_space<vmem>>, vector<8x1xf32>
      tpu.vector_store %arg6[%c0_34, %c0_35], %38 {strides = array<i32>} : memref<8x1xf32, #tpu.memory_space<vmem>>, vector<8x1xf32>,
      %cst_36 = arith.constant 0.000000e+00 : f32
      %40 = vector.broadcast %cst_36 : f32 to vector<8x1xf32>
      %c0_37 = arith.constant 0 : index
      %c0_38 = arith.constant 0 : index
      %41 = vector.load %arg7[%c0_37, %c0_38] : memref<8x1xf32, #tpu.memory_space<vmem>>, vector<8x1xf32>
      tpu.vector_store %arg7[%c0_37, %c0_38], %40 {strides = array<i32>} : memref<8x1xf32, #tpu.memory_space<vmem>>, vector<8x1xf32>,
      %cst_39 = arith.constant 0.000000e+00 : f32
      %42 = vector.broadcast %cst_39 : f32 to vector<8x1xf32>
      %c0_40 = arith.constant 0 : index
      %c0_41 = arith.constant 0 : index
      %43 = vector.load %arg8[%c0_40, %c0_41] : memref<8x1xf32, #tpu.memory_space<vmem>>, vector<8x1xf32>
      tpu.vector_store %arg8[%c0_40, %c0_41], %42 {strides = array<i32>} : memref<8x1xf32, #tpu.memory_space<vmem>>, vector<8x1xf32>,
      %cst_42 = arith.constant 0.000000e+00 : f32
      %44 = vector.broadcast %cst_42 : f32 to vector<8x1xf32>
      %c0_43 = arith.constant 0 : index
      %c0_44 = arith.constant 0 : index
      %45 = vector.load %arg9[%c0_43, %c0_44] : memref<8x1xf32, #tpu.memory_space<vmem>>, vector<8x1xf32>
      tpu.vector_store %arg9[%c0_43, %c0_44], %44 {strides = array<i32>} : memref<8x1xf32, #tpu.memory_space<vmem>>, vector<8x1xf32>,
    } else {
    }
    %c0 = arith.constant 0 : index
    %c0_1 = arith.constant 0 : index
    %3 = vector.load %arg2[%c0, %c0_1] : memref<8x256xf32, #tpu.memory_space<vmem>>, vector<8x256xf32>
    %c0_2 = arith.constant 0 : index
    %c0_3 = arith.constant 0 : index
    %4 = vector.load %arg3[%c0_2, %c0_3] : memref<8x256xf32, #tpu.memory_space<vmem>>, vector<8x256xf32>
    %c0_4 = arith.constant 0 : index
    %c0_5 = arith.constant 0 : index
    %5 = vector.load %arg5[%c0_4, %c0_5] : memref<8x1xf32, #tpu.memory_space<vmem>>, vector<8x1xf32>
    %cst = arith.constant dense<0.000000e+00> : vector<8xf32>
    %6 = vector.multi_reduction <add>, %3, %cst [1] : vector<8x256xf32> to vector<8xf32>
    %7 = vector.shape_cast %6 : vector<8xf32> to vector<8x1xf32>
    %8 = arith.addf %5, %7 : vector<8x1xf32>
    %c0_6 = arith.constant 0 : index
    %c0_7 = arith.constant 0 : index
    %9 = vector.load %arg5[%c0_6, %c0_7] : memref<8x1xf32, #tpu.memory_space<vmem>>, vector<8x1xf32>
    tpu.vector_store %arg5[%c0_6, %c0_7], %8 {strides = array<i32>} : memref<8x1xf32, #tpu.memory_space<vmem>>, vector<8x1xf32>,
    %c0_8 = arith.constant 0 : index
    %c0_9 = arith.constant 0 : index
    %10 = vector.load %arg6[%c0_8, %c0_9] : memref<8x1xf32, #tpu.memory_space<vmem>>, vector<8x1xf32>
    %cst_10 = arith.constant dense<0.000000e+00> : vector<8xf32>
    %11 = vector.multi_reduction <add>, %4, %cst_10 [1] : vector<8x256xf32> to vector<8xf32>
    %12 = vector.shape_cast %11 : vector<8xf32> to vector<8x1xf32>
    %13 = arith.addf %10, %12 : vector<8x1xf32>
    %c0_11 = arith.constant 0 : index
    %c0_12 = arith.constant 0 : index
    %14 = vector.load %arg6[%c0_11, %c0_12] : memref<8x1xf32, #tpu.memory_space<vmem>>, vector<8x1xf32>
    tpu.vector_store %arg6[%c0_11, %c0_12], %13 {strides = array<i32>} : memref<8x1xf32, #tpu.memory_space<vmem>>, vector<8x1xf32>,
    %c0_13 = arith.constant 0 : index
    %c0_14 = arith.constant 0 : index
    %15 = vector.load %arg7[%c0_13, %c0_14] : memref<8x1xf32, #tpu.memory_space<vmem>>, vector<8x1xf32>
    %16 = arith.mulf %3, %4 : vector<8x256xf32>
    %cst_15 = arith.constant dense<0.000000e+00> : vector<8xf32>
    %17 = vector.multi_reduction <add>, %16, %cst_15 [1] : vector<8x256xf32> to vector<8xf32>
    %18 = vector.shape_cast %17 : vector<8xf32> to vector<8x1xf32>
    %19 = arith.addf %15, %18 : vector<8x1xf32>
    %c0_16 = arith.constant 0 : index
    %c0_17 = arith.constant 0 : index
    %20 = vector.load %arg7[%c0_16, %c0_17] : memref<8x1xf32, #tpu.memory_space<vmem>>, vector<8x1xf32>
    tpu.vector_store %arg7[%c0_16, %c0_17], %19 {strides = array<i32>} : memref<8x1xf32, #tpu.memory_space<vmem>>, vector<8x1xf32>,
    %c0_18 = arith.constant 0 : index
    %c0_19 = arith.constant 0 : index
    %21 = vector.load %arg8[%c0_18, %c0_19] : memref<8x1xf32, #tpu.memory_space<vmem>>, vector<8x1xf32>
    %22 = arith.mulf %3, %3 : vector<8x256xf32>
    %cst_20 = arith.constant dense<0.000000e+00> : vector<8xf32>
    %23 = vector.multi_reduction <add>, %22, %cst_20 [1] : vector<8x256xf32> to vector<8xf32>
    %24 = vector.shape_cast %23 : vector<8xf32> to vector<8x1xf32>
    %25 = arith.addf %21, %24 : vector<8x1xf32>
    %c0_21 = arith.constant 0 : index
    %c0_22 = arith.constant 0 : index
    %26 = vector.load %arg8[%c0_21, %c0_22] : memref<8x1xf32, #tpu.memory_space<vmem>>, vector<8x1xf32>
    tpu.vector_store %arg8[%c0_21, %c0_22], %25 {strides = array<i32>} : memref<8x1xf32, #tpu.memory_space<vmem>>, vector<8x1xf32>,
    %c0_23 = arith.constant 0 : index
    %c0_24 = arith.constant 0 : index
    %27 = vector.load %arg9[%c0_23, %c0_24] : memref<8x1xf32, #tpu.memory_space<vmem>>, vector<8x1xf32>
    %28 = arith.mulf %4, %4 : vector<8x256xf32>
    %cst_25 = arith.constant dense<0.000000e+00> : vector<8xf32>
    %29 = vector.multi_reduction <add>, %28, %cst_25 [1] : vector<8x256xf32> to vector<8xf32>
    %30 = vector.shape_cast %29 : vector<8xf32> to vector<8x1xf32>
    %31 = arith.addf %27, %30 : vector<8x1xf32>
    %c0_26 = arith.constant 0 : index
    %c0_27 = arith.constant 0 : index
    %32 = vector.load %arg9[%c0_26, %c0_27] : memref<8x1xf32, #tpu.memory_space<vmem>>, vector<8x1xf32>
    tpu.vector_store %arg9[%c0_26, %c0_27], %31 {strides = array<i32>} : memref<8x1xf32, #tpu.memory_space<vmem>>, vector<8x1xf32>,
    %c0_i32_28 = arith.constant 0 : i32
    %33 = arith.cmpi eq, %arg1, %c0_i32_28 : i32
    %34 = arith.extui %33 : i1 to i32
    %c0_i32_29 = arith.constant 0 : i32
    %35 = arith.cmpi ne, %34, %c0_i32_29 : i32
    scf.if %35 {
      %c0_30 = arith.constant 0 : index
      %c0_31 = arith.constant 0 : index
      %36 = vector.load %arg7[%c0_30, %c0_31] : memref<8x1xf32, #tpu.memory_space<vmem>>, vector<8x1xf32>
      %c0_32 = arith.constant 0 : index
      %c0_33 = arith.constant 0 : index
      %37 = vector.load %arg5[%c0_32, %c0_33] : memref<8x1xf32, #tpu.memory_space<vmem>>, vector<8x1xf32>
      %c0_34 = arith.constant 0 : index
      %c0_35 = arith.constant 0 : index
      %38 = vector.load %arg6[%c0_34, %c0_35] : memref<8x1xf32, #tpu.memory_space<vmem>>, vector<8x1xf32>
      %39 = arith.mulf %37, %38 : vector<8x1xf32>
      %cst_36 = arith.constant 3.906250e-03 : f32
      %40 = vector.broadcast %cst_36 : f32 to vector<8x1xf32>
      %41 = arith.mulf %39, %40 : vector<8x1xf32>
      %42 = arith.subf %36, %41 : vector<8x1xf32>
      %c0_37 = arith.constant 0 : index
      %c0_38 = arith.constant 0 : index
      %43 = vector.load %arg8[%c0_37, %c0_38] : memref<8x1xf32, #tpu.memory_space<vmem>>, vector<8x1xf32>
      %c0_39 = arith.constant 0 : index
      %c0_40 = arith.constant 0 : index
      %44 = vector.load %arg5[%c0_39, %c0_40] : memref<8x1xf32, #tpu.memory_space<vmem>>, vector<8x1xf32>
      %c0_41 = arith.constant 0 : index
      %c0_42 = arith.constant 0 : index
      %45 = vector.load %arg5[%c0_41, %c0_42] : memref<8x1xf32, #tpu.memory_space<vmem>>, vector<8x1xf32>
      %46 = arith.mulf %44, %45 : vector<8x1xf32>
      %cst_43 = arith.constant 3.906250e-03 : f32
      %47 = vector.broadcast %cst_43 : f32 to vector<8x1xf32>
      %48 = arith.mulf %46, %47 : vector<8x1xf32>
      %49 = arith.subf %43, %48 : vector<8x1xf32>
      %c0_44 = arith.constant 0 : index
      %c0_45 = arith.constant 0 : index
      %50 = vector.load %arg9[%c0_44, %c0_45] : memref<8x1xf32, #tpu.memory_space<vmem>>, vector<8x1xf32>
      %c0_46 = arith.constant 0 : index
      %c0_47 = arith.constant 0 : index
      %51 = vector.load %arg6[%c0_46, %c0_47] : memref<8x1xf32, #tpu.memory_space<vmem>>, vector<8x1xf32>
      %c0_48 = arith.constant 0 : index
      %c0_49 = arith.constant 0 : index
      %52 = vector.load %arg6[%c0_48, %c0_49] : memref<8x1xf32, #tpu.memory_space<vmem>>, vector<8x1xf32>
      %53 = arith.mulf %51, %52 : vector<8x1xf32>
      %cst_50 = arith.constant 3.906250e-03 : f32
      %54 = vector.broadcast %cst_50 : f32 to vector<8x1xf32>
      %55 = arith.mulf %53, %54 : vector<8x1xf32>
      %56 = arith.subf %50, %55 : vector<8x1xf32>
      %cst_51 = arith.constant 0.000000e+00 : f32
      %57 = vector.broadcast %cst_51 : f32 to vector<8x1xf32>
      %58 = arith.subf %57, %42 : vector<8x1xf32>
      %59 = arith.mulf %49, %56 : vector<8x1xf32>
      %60 = math.rsqrt %59 : vector<8x1xf32>
      %61 = arith.mulf %58, %60 : vector<8x1xf32>
      %c0_52 = arith.constant 0 : index
      %c0_53 = arith.constant 0 : index
      %62 = vector.load %arg4[%c0_52, %c0_53] : memref<8x1xf32, #tpu.memory_space<vmem>>, vector<8x1xf32>
      tpu.vector_store %arg4[%c0_52, %c0_53], %61 {strides = array<i32>} : memref<8x1xf32, #tpu.memory_space<vmem>>, vector<8x1xf32>,
    } else {
    }
    return
  }
  func.func @transform_0(%arg0: i32, %arg1: i32) -> (i32, i32) {
    %c0_i32 = arith.constant 0 : i32
    return %arg0, %arg1 : i32, i32
  }
  func.func @transform_1(%arg0: i32, %arg1: i32) -> (i32, i32) {
    %c0_i32 = arith.constant 0 : i32
    return %arg0, %arg1 : i32, i32
  }
  func.func @transform_2(%arg0: i32, %arg1: i32) -> (i32, i32) {
    %c0_i32 = arith.constant 0 : i32
    %c0_i32_0 = arith.constant 0 : i32
    return %arg0, %c0_i32 : i32, i32
  }
}

</mosaic_0001>

<bundles_post_ra>
// kernel: npcc_loss.1
= control target key start
LH: loop header
LB: loop body
LE: loop exit
PB: predicated region body
PF: predicated region fallthrough
CT: control target
= control target key end

     0   :  { %vm15_vm0 = vcmask 7168   ;;  %v91_v3 = vmov 0.0   ;;  %s133_s0 = inlined_call_operand.vmem [shape: f32[8,256], index: 0, kind: input, shape index: {}]   ;;  %s134_s1 = inlined_call_operand.vmem [shape: f32[8,256], index: 1, kind: input, shape index: {}]   ;;  %s135_s2 = inlined_call_operand.vmem [shape: f32[8,1], index: 2, kind: output, shape index: {}]  }
   0x1   :  { %v21_v0 = vld [vmem:[%s133_s0] sm:$0xff]  ;;  %v22_v1 = vld [vmem:[%s133_s0 + $0x8] sm:$0xff]  ;;  %16 = vst.msk [vmem:[#allocation2] sm:$0xff] %vm15_vm0, %v91_v3  ;;  %17 = vst.msk [vmem:[#allocation3] sm:$0xff] %vm15_vm0, %v91_v3 }
   0x2   :  { %v23_v2 = vld [vmem:[%s134_s1] sm:$0xff]  ;;  %18 = vst.msk [vmem:[#allocation4] sm:$0xff] %vm15_vm0, %v91_v3  ;;  %19 = vst.msk [vmem:[#allocation5] sm:$0xff] %vm15_vm0, %v91_v3  ;;  %v26_v4 = vadd.f32 %v22_v1, %v21_v0  ;;  %v47_v5 = vmul.f32 %v21_v0, %v21_v0  ;;  %v48_v6 = vmul.f32 %v22_v1, %v22_v1  ;;  %v24_v7 = vld [vmem:[%s134_s1 + $0x8] sm:$0xff] }
   0x3   :  { %20 = vst.msk [vmem:[#allocation6] sm:$0xff] %vm15_vm0, %v91_v3  ;;  %v55_v8 = vmul.f32 %v23_v2, %v23_v2  ;;  %v56_v9 = vmul.f32 %v24_v7, %v24_v7  ;;  %v33_v11 = vadd.f32 %v24_v7, %v23_v2  ;;  %v39_v12 = vmul.f32 %v23_v2, %v21_v0 }
   0x4   :  { %27 = vadd.xlane.f32.xlu0 %v26_v4  ;;  %v49_v10 = vadd.f32 %v48_v6, %v47_v5  ;;  %v40_v13 = vmul.f32 %v24_v7, %v22_v1 }
   0x5   :  { %v57_v14 = vadd.f32 %v56_v9, %v55_v8 }
   0x6   :  { %50 = vadd.xlane.f32.xlu1 %v49_v10  ;;  %v41_v15 = vadd.f32 %v40_v13, %v39_v12 }
   0x8   :  { %34 = vadd.xlane.f32.xlu0 %v33_v11  ;;  %v25_v16 = vld [vmem:[#allocation2] sm:$0xff]  ;;  %v32_v21 = vld [vmem:[#allocation3] sm:$0xff] }
   0x9   :  { %v46_v18 = vld [vmem:[#allocation5] sm:$0xff]  ;;  %v38_v27 = vld [vmem:[#allocation4] sm:$0xff] }
   0xa   :  { %58 = vadd.xlane.f32.xlu1 %v57_v14  ;;  %v54_v24 = vld [vmem:[#allocation6] sm:$0xff] }
   0xc   :  { %42 = vadd.xlane.f32.xlu0 %v41_v15 }
  0x8d   :  { %v28_v17 = vpop.xlane.xlu0 %27 }
  0x8e   :  { %v29_v19 = vadd.f32 %v28_v17, %v25_v16 }
  0x8f   :  { %v51_v20 = vpop.xlane.xlu1 %50 }
  0x90   :  { %31 = vst.msk [vmem:[#allocation2] sm:$0xff] %vm15_vm0, %v29_v19  ;;  %v52_v22 = vadd.f32 %v51_v20, %v46_v18 }
  0x91   :  { %v35_v23 = vpop.xlane.xlu0 %34 }
  0x92   :  { %53 = vst.msk [vmem:[#allocation5] sm:$0xff] %vm15_vm0, %v52_v22  ;;  %v36_v25 = vadd.f32 %v35_v23, %v32_v21 }
  0x93   :  { %v59_v26 = vpop.xlane.xlu1 %58 }
  0x94   :  { %37 = vst.msk [vmem:[#allocation3] sm:$0xff] %vm15_vm0, %v36_v25  ;;  %v60_v28 = vadd.f32 %v59_v26, %v54_v24 }
  0x95   :  { %v43_v29 = vpop.xlane.xlu0 %42 }
  0x96   :  { %61 = vst.msk [vmem:[#allocation6] sm:$0xff] %vm15_vm0, %v60_v28  ;;  %v44_v30 = vadd.f32 %v43_v29, %v38_v27 }
  0x97   :  { %v66_v31 = vld [vmem:[#allocation2] sm:$0xff] }
  0x98   :  { %v72_v32 = vmul.f32 %v66_v31, %v66_v31  ;;  %45 = vst.msk [vmem:[#allocation4] sm:$0xff] %vm15_vm0, %v44_v30 }
  0x99   :  { %v71_v36 = vld [vmem:[#allocation5] sm:$0xff] }
  0x9a   :  { %v73_v34 = vmul.f32 0.00390625, %v72_v32 }
  0x9b   :  { %v67_v33 = vld [vmem:[#allocation3] sm:$0xff] }
  0x9c   :  { %v76_v35 = vmul.f32 %v67_v33, %v67_v33  ;;  %v74_v39 = vsub.f32 %v71_v36, %v73_v34  ;;  %v68_v42 = vmul.f32 %v67_v33, %v66_v31 }
  0x9d   :  { %v75_v37 = vld [vmem:[#allocation6] sm:$0xff] }
  0x9e   :  { %v77_v38 = vmul.f32 0.00390625, %v76_v35  ;;  %v69_v43 = vmul.f32 0.00390625, %v68_v42 }
  0x9f   :  { %v65_v44 = vld [vmem:[#allocation4] sm:$0xff] }
  0xa0   :  { %v78_v40 = vsub.f32 %v75_v37, %v77_v38  ;;  %v70_v45 = vsub.f32 %v65_v44, %v69_v43 }
  0xa2   :  { %v80_v41 = vmul.f32 %v78_v40, %v74_v39  ;;  %v79_v46 = vsub.f32 0.0, %v70_v45 }
  0xa4   :  { %89 = vrsqrt.f32 %v80_v41 }
  0xb1   :  { %v90_v47 = vpop.eup %89 }
  0xb2   :  { %v82_v48 = vmul.f32 %v90_v47, %v79_v46 }
  0xb4   :  { %83 = vst.msk [vmem:[%s135_s2] sm:$0xff] %vm15_vm0, %v82_v48 }

</bundles_post_ra>
